<compile_context>
chip_gen: v7x
topology: tpu7x:2x2x1
jax: 0.10.0
libtpu: 0.0.40
codegen_flags: <defaults>
</compile_context>

<pallas_src>
import functools

import jax
import jax.numpy as jnp
from jax.experimental import pallas as pl
from jax.experimental.pallas import tpu as pltpu


# ------------------------------ helpers ------------------------------------ #
def _round_up(n, m):
    return ((n + m - 1) // m) * m


_SINGLE_BUFFER_OK = [True]   # flipped off at runtime if pl.Buffered(1) rejects


def _weight_spec(arr, single_buffered):
    nd = arr.ndim
    idx_map = lambda i, _nd=nd: (0,) * _nd
    if single_buffered:
        # Weights are grid-invariant: single-buffer them (saves VMEM on v7x).
        return pl.BlockSpec(arr.shape, idx_map, pipeline_mode=pl.Buffered(1))
    return pl.BlockSpec(arr.shape, idx_map)


# ----------------------------- Pallas kernel ------------------------------- #
def _fused_mlp_kernel(x_ref, w0_ref, b0_ref, wh_ref, bh_ref,
                      whead_ref, bhead_ref, out_ref, *, layer_num):
    """Single Linear->ReLU chain over the block-diagonal fused weights.

    x_ref: (tb, din_long) f32 -> cast to bf16 in-kernel; accumulation in f32.
    out_ref: (tb, o_pad) f32 with o_pad a multiple of 128 (lane-dense store).
    """
    x = x_ref[...].astype(jnp.bfloat16)
    h = jnp.dot(x, w0_ref[...], preferred_element_type=jnp.float32) + b0_ref[...]
    h = jnp.maximum(h, 0.0)
    for l in range(layer_num):        # static unroll; layer_num is small
        h = jnp.dot(h.astype(jnp.bfloat16), wh_ref[l],
                    preferred_element_type=jnp.float32) + bh_ref[l]
        h = jnp.maximum(h, 0.0)
    out_ref[...] = (jnp.dot(h.astype(jnp.bfloat16), whead_ref[...],
                            preferred_element_type=jnp.float32) + bhead_ref[...])


# ------------------------------ wrappers ------------------------------------ #
def _batch_tiling(b, max_tb=512):
    """>=16 rows per tile (bf16 sublane pack); >=2 grid steps when the padded
    batch allows (so "parallel" shards over both v7x TensorCores); tiles up to
    max_tb rows to amortize the ~0.35us per-grid-step overhead."""
    pb = _round_up(max(b, 1), 16)
    if pb >= 32:
        tb = min(max_tb, _round_up(pb // 2, 16))
    else:
        tb = pb
    pb = _round_up(pb, tb)
    return tb, pb


def _vmem_limit_bytes(tb, din, o_pad, params):
    weight_bytes = sum(int(p.size) * p.dtype.itemsize for p in params)
    io_bytes = 2 * tb * din * 4 + 2 * tb * o_pad * 4     # double-buffered blocks
    total = int((2 * weight_bytes + io_bytes) * 1.5) + (4 << 20)
    return int(min(max(total, 16 << 20), 100 << 20))


def _run_fused(x_flat, fp, layer_num):
    """x_flat: (b, din_long). Returns (b, o_pad) f32 = [mu_s|ls_s|mu_l|ls_l|0...]."""
    b, din = x_flat.shape
    o_pad = fp["bhead"].shape[-1]
    tb, pb = _batch_tiling(b)
    x = x_flat.astype(jnp.float32)
    if pb != b:
        x = jnp.pad(x, ((0, pb - b), (0, 0)))
    params = [fp["w0"], fp["b0"], fp["wh"], fp["bh"], fp["whead"], fp["bhead"]]

    def _call(single_buffered):
        in_specs = ([pl.BlockSpec((tb, din), lambda i: (i, 0))]
                    + [_weight_spec(p, single_buffered) for p in params])
        return pl.pallas_call(
            functools.partial(_fused_mlp_kernel, layer_num=layer_num),
            out_shape=jax.ShapeDtypeStruct((pb, o_pad), jnp.float32),
            grid_spec=pltpu.PrefetchScalarGridSpec(
                num_scalar_prefetch=0,
                grid=(pb // tb,),
                in_specs=in_specs,
                out_specs=pl.BlockSpec((tb, o_pad), lambda i: (i, 0))),
            compiler_params=pltpu.CompilerParams(
                dimension_semantics=("parallel",),
                vmem_limit_bytes=_vmem_limit_bytes(tb, din, o_pad, params)),
        )(x, *params)

    if _SINGLE_BUFFER_OK[0]:
        try:
            return _call(True)[:b]
        except Exception:            # pl.Buffered(1) unsupported -> fall back
            _SINGLE_BUFFER_OK[0] = False
    return _call(False)[:b]


# ---------------------------- parameter setup ------------------------------ #
def _make_raw_encoder_weights(key, din, embed_dim, latent_dim, layer_num):
    ks = jax.random.split(key, 4)
    scale0 = 1.0 / float(din) ** 0.5
    scaleh = 1.0 / float(embed_dim) ** 0.5
    w0 = jax.random.normal(ks[0], (din, embed_dim), jnp.float32) * scale0
    wh = jax.random.normal(ks[1], (max(layer_num, 1), embed_dim, embed_dim),
                           jnp.float32) * scaleh
    wmu = jax.random.normal(ks[2], (embed_dim, latent_dim), jnp.float32) * scaleh
    wls = jax.random.normal(ks[3], (embed_dim, latent_dim), jnp.float32) * scaleh
    whead = jnp.concatenate([wmu, wls], axis=1)      # fused (mu | logsigma) head
    return {"w0": w0, "wh": wh, "whead": whead}


def _build_fused_params(prior, post, din_s, din_l, embed_dim, latent_dim,
                        layer_num):
    """Block-diagonal fusion of prior + posterior MLPs, zero-padded so hidden
    and output widths are multiples of 128 lanes.  Zero rows/blocks keep the
    results identical to running the two encoders separately."""
    two_l = 2 * latent_dim
    h = 2 * embed_dim
    h_pad = _round_up(max(h, 128), 128)
    o_pad = _round_up(max(2 * two_l, 128), 128)
    nl = max(layer_num, 1)

    w0 = jnp.zeros((din_l, h_pad), jnp.float32)
    w0 = w0.at[:din_s, :embed_dim].set(prior["w0"])      # prior: leading din_s rows
    w0 = w0.at[:, embed_dim:h].set(post["w0"])           # posterior: all rows
    wh = jnp.zeros((nl, h_pad, h_pad), jnp.float32)
    wh = wh.at[:, :embed_dim, :embed_dim].set(prior["wh"])
    wh = wh.at[:, embed_dim:h, embed_dim:h].set(post["wh"])
    whead = jnp.zeros((h_pad, o_pad), jnp.float32)
    whead = whead.at[:embed_dim, :two_l].set(prior["whead"])
    whead = whead.at[embed_dim:h, two_l:2 * two_l].set(post["whead"])

    return {
        "w0": w0.astype(jnp.bfloat16),
        "b0": jnp.zeros((1, h_pad), jnp.float32),
        "wh": wh.astype(jnp.bfloat16),
        "bh": jnp.zeros((nl, 1, h_pad), jnp.float32),
        "whead": whead.astype(jnp.bfloat16),
        "bhead": jnp.zeros((1, o_pad), jnp.float32),
    }


# ------------------------------ PREstimator -------------------------------- #
class PREstimatorPallas:
    def __init__(self, config, key):
        dim_decoder = config["dim_decoder"]
        num_heads_decoder = config["num_heads_decoder"]
        assert dim_decoder % num_heads_decoder == 0
        depth_decoder = dim_decoder // num_heads_decoder
        c_encoder = depth_decoder * (depth_decoder - 1) / 2
        print("旋转基个数 {}".format(c_encoder))

        self.len_short = config["len_short"]
        self.len_long = config["len_long"]
        self.num_point = config["num_point"]
        self.input_dim = config["input_dim"]
        self.latent_dim = config["latent_dim"]
        self.layer_num = config["layer_num"]
        self.use_post_sigma = config["use_post_sigma"]
        self.embed_dim = config["embed_dim"]

        self.din_s = self.len_short * self.num_point * self.input_dim
        self.din_l = self.len_long * self.num_point * self.input_dim

        k_prior, k_post = jax.random.split(key)
        self.prior_raw = _make_raw_encoder_weights(
            k_prior, self.din_s, self.embed_dim, self.latent_dim, self.layer_num)
        self.post_raw = _make_raw_encoder_weights(
            k_post, self.din_l, self.embed_dim, self.latent_dim, self.layer_num)
        self.fused_params = _build_fused_params(
            self.prior_raw, self.post_raw, self.din_s, self.din_l,
            self.embed_dim, self.latent_dim, self.layer_num)

    def _split(self, out):
        L = self.latent_dim
        return (out[:, :L], out[:, L:2 * L],
                out[:, 2 * L:3 * L], out[:, 3 * L:4 * L])

    # -- standalone encoder calls (API parity with the reference module) ---- #
    def prior_forward(self, btnd):
        b, t, n, d = btnd.shape
        if t != self.len_short:
            raise ValueError("t 必须为 {}".format(self.len_short))
        x = btnd.reshape(b, t * n * d)
        # Prior weights only read the leading din_s columns; zero-pad to din_l
        # and reuse the single fused kernel (posterior half is discarded).
        x = jnp.pad(x.astype(jnp.float32),
                    ((0, 0), (0, self.din_l - self.din_s)))
        out = _run_fused(x, self.fused_params, self.layer_num)
        mu_s, logsigma_s, _, _ = self._split(out)
        return mu_s, logsigma_s

    def post_forward(self, btnd):
        b, t, n, d = btnd.shape
        if t != self.len_long:
            raise ValueError("t 必须为 {}".format(self.len_long))
        x = btnd.reshape(b, t * n * d)
        out = _run_fused(x, self.fused_params, self.layer_num)
        _, _, mu_l, logsigma_l = self._split(out)
        if self.use_post_sigma:
            return mu_l, logsigma_l
        return mu_l    # acts as z when no posterior sigma is used

    # -- fused forward (prior + posterior in ONE pallas_call) --------------- #
    def __call__(self, btnd):
        b, t, n, d = btnd.shape
        if (n, d) != (self.num_point, self.input_dim):
            raise ValueError(
                "点数n 维数d 不符合, 期望 (n,d) 为 ({},{}), 得到了({},{})".format(
                    self.num_point, self.input_dim, n, d))
        if t < self.len_long:
            raise ValueError("时间长度t不足, 期望t大于 {}, 却得到了{}".format(
                self.len_long, t))
        x_l = btnd[:, :self.len_long].reshape(b, self.din_l)
        out = _run_fused(x_l, self.fused_params, self.layer_num)
        mu_s, logsigma_s, mu_l, logsigma_l = self._split(out)
        if self.use_post_sigma:
            return mu_s, logsigma_s, mu_l, logsigma_l
        return mu_s, logsigma_s, mu_l    # mu_l acts as z

    def get_loss(self, btnd):
        if self.use_post_sigma:
            mu_s, logsigma_s, mu_l, logsigma_l = self(btnd)
            return cal_kl_divergence(mu_l, mu_s, logsigma_l, logsigma_s)
        mu_s, logsigma_s, z = self(btnd)
        return cal_max_likelihood_loss(mu_s, logsigma_s, z)


# --------------------------- plain-JAX loss glue --------------------------- #
# NOTE: formulas kept faithful to the PyTorch reference (including its
# non-standard sigma1/sigma2 trace term), not the textbook Gaussian KL.
def cal_kl_divergence(mu1, mu2, log_sigma1, log_sigma2, eps=1e-08):
    b, dim = mu1.shape
    sigma1 = jnp.exp(log_sigma1)
    sigma2 = jnp.exp(log_sigma2)
    kl = 0.5 * (log_sigma1.sum(1) - log_sigma2.sum(1) - dim
                + ((mu1 - mu2) ** 2 / (sigma2 ** 2 + eps)).sum(1)
                + (sigma1 / sigma2).sum(1))
    return kl.mean()


def cal_max_likelihood_loss(mu, logsigma, x, eps=1e-08):
    sigma = jnp.exp(logsigma)
    loss = logsigma.sum(1) + 0.5 * ((x - mu) ** 2 / (sigma ** 2 + eps)).sum(1)
    return loss.mean()


# ------------------------- plain-JAX reference check ----------------------- #
def _ref_encode(x, raw, layer_num):
    """Per-encoder reference using the same bf16 weights (sanity check for the
    block-diagonal fusion)."""
    h = jnp.dot(x.astype(jnp.bfloat16), raw["w0"].astype(jnp.bfloat16),
                preferred_element_type=jnp.float32)
    h = jnp.maximum(h, 0.0)
    for l in range(layer_num):
        h = jnp.dot(h.astype(jnp.bfloat16), raw["wh"][l].astype(jnp.bfloat16),
                    preferred_element_type=jnp.float32)
        h = jnp.maximum(h, 0.0)
    return jnp.dot(h.astype(jnp.bfloat16), raw["whead"].astype(jnp.bfloat16),
                   preferred_element_type=jnp.float32)


# ---------------------------------- main ----------------------------------- #
if __name__ == "__main__":
    config = {
        "posterior_encoder_name": "FixShapeEncoder",
        "prior_encoder_name": "FixShapeEncoder",
        "dim_decoder": 32,
        "num_heads_decoder": 4,
        "len_short": 4,
        "len_long": 8,
        "num_point": 4,
        "input_dim": 4,
        "embed_dim": 32,
        "latent_dim": 16,
        "layer_num": 2,
        "use_post_sigma": True,
        "use_posterior_sigma": True,
        "use_prior_sigma": True,
    }

    key = jax.random.PRNGKey(0)
    k_params, k_data = jax.random.split(key)
    model = PREstimatorPallas(config, k_params)

    b, t, n, d = 2, config["len_long"], config["num_point"], config["input_dim"]
    btnd = jax.random.normal(k_data, (b, t, n, d), jnp.float32)

    mu_s, logsigma_s, mu_l, logsigma_l = model(btnd)
    loss = model.get_loss(btnd)
    mu_s2, ls_s2 = model.prior_forward(btnd[:, :config["len_short"]])

    jax.block_until_ready((mu_s, logsigma_s, mu_l, logsigma_l, loss,
                           mu_s2, ls_s2))

    L = config["latent_dim"]
    assert mu_s.shape == (b, L) and logsigma_s.shape == (b, L)
    assert mu_l.shape == (b, L) and logsigma_l.shape == (b, L)
    assert mu_s2.shape == (b, L) and ls_s2.shape == (b, L)
    assert bool(jnp.isfinite(loss))

    # Sanity: fused block-diagonal kernel matches per-encoder plain-JAX math.
    x_s = btnd[:, :config["len_short"]].reshape(b, -1)
    x_l = btnd[:, :config["len_long"]].reshape(b, -1)
    ref_s = _ref_encode(x_s, model.prior_raw, config["layer_num"])
    ref_l = _ref_encode(x_l, model.post_raw, config["layer_num"])
    ref = jnp.concatenate([ref_s, ref_l], axis=1)
    got = jnp.concatenate([mu_s, logsigma_s, mu_l, logsigma_l], axis=1)
    assert float(jnp.max(jnp.abs(got - ref))) < 5e-2

    print("KERNEL_OK")
</pallas_src>

<mosaic_0001>
module attributes {stable_mosaic.version = 11 : i64} {
  func.func @_fused_mlp_kernel(%arg0: i32, %arg1: memref<16x128xf32, #tpu.memory_space<vmem>>, %arg2: memref<128x128xbf16, #tpu.memory_space<vmem>>, %arg3: memref<1x128xf32, #tpu.memory_space<vmem>>, %arg4: memref<2x128x128xbf16, #tpu.memory_space<vmem>>, %arg5: memref<2x1x128xf32, #tpu.memory_space<vmem>>, %arg6: memref<128x128xbf16, #tpu.memory_space<vmem>>, %arg7: memref<1x128xf32, #tpu.memory_space<vmem>>, %arg8: memref<16x128xf32, #tpu.memory_space<vmem>>) attributes {dimension_semantics = [#tpu.dimension_semantics<parallel>], iteration_bounds = array<i64: 1>, scalar_prefetch = 0 : i64, scratch_operands = 0 : i64, tpu.core_type = #tpu.core_type<tc>, window_params = [{transform_indices = @transform_0, window_bounds = array<i64: 16, 128>}, {pipeline_mode = #tpu.pipeline_mode<synchronous>, transform_indices = @transform_1, window_bounds = array<i64: 128, 128>}, {pipeline_mode = #tpu.pipeline_mode<synchronous>, transform_indices = @transform_2, window_bounds = array<i64: 1, 128>}, {pipeline_mode = #tpu.pipeline_mode<synchronous>, transform_indices = @transform_3, window_bounds = array<i64: 2, 128, 128>}, {pipeline_mode = #tpu.pipeline_mode<synchronous>, transform_indices = @transform_4, window_bounds = array<i64: 2, 1, 128>}, {pipeline_mode = #tpu.pipeline_mode<synchronous>, transform_indices = @transform_5, window_bounds = array<i64: 128, 128>}, {pipeline_mode = #tpu.pipeline_mode<synchronous>, transform_indices = @transform_6, window_bounds = array<i64: 1, 128>}, {transform_indices = @transform_7, window_bounds = array<i64: 16, 128>}]} {
    %c0 = arith.constant 0 : index
    %c0_0 = arith.constant 0 : index
    %0 = vector.load %arg1[%c0, %c0_0] : memref<16x128xf32, #tpu.memory_space<vmem>>, vector<16x128xf32>
    %1 = arith.truncf %0 : vector<16x128xf32> to vector<16x128xbf16>
    %c0_1 = arith.constant 0 : index
    %c0_2 = arith.constant 0 : index
    %2 = vector.load %arg2[%c0_1, %c0_2] : memref<128x128xbf16, #tpu.memory_space<vmem>>, vector<128x128xbf16>
    %cst = arith.constant dense<0.000000e+00> : vector<16x128xf32>
    %3 = tpu.matmul %1, %2, %cst {dimension_numbers = #tpu.dot_dimension_numbers<[1], [0], [0], [1], [0, 0, 1, 1], [], []>} : vector<16x128xbf16>, vector<128x128xbf16>, vector<16x128xf32> -> vector<16x128xf32>
    %c0_3 = arith.constant 0 : index
    %c0_4 = arith.constant 0 : index
    %4 = vector.load %arg3[%c0_3, %c0_4] : memref<1x128xf32, #tpu.memory_space<vmem>>, vector<1x128xf32>
    %5 = vector.broadcast %4 : vector<1x128xf32> to vector<16x128xf32>
    %6 = arith.addf %3, %5 : vector<16x128xf32>
    %cst_5 = arith.constant 0.000000e+00 : f32
    %7 = vector.broadcast %cst_5 : f32 to vector<16x128xf32>
    %8 = arith.maximumf %6, %7 : vector<16x128xf32>
    %9 = arith.truncf %8 : vector<16x128xf32> to vector<16x128xbf16>
    %c0_6 = arith.constant 0 : index
    %c0_7 = arith.constant 0 : index
    %c0_8 = arith.constant 0 : index
    %10 = vector.load %arg4[%c0_6, %c0_7, %c0_8] : memref<2x128x128xbf16, #tpu.memory_space<vmem>>, vector<1x128x128xbf16>
    %11 = vector.shape_cast %10 : vector<1x128x128xbf16> to vector<128x128xbf16>
    %cst_9 = arith.constant dense<0.000000e+00> : vector<16x128xf32>
    %12 = tpu.matmul %9, %11, %cst_9 {dimension_numbers = #tpu.dot_dimension_numbers<[1], [0], [0], [1], [0, 0, 1, 1], [], []>} : vector<16x128xbf16>, vector<128x128xbf16>, vector<16x128xf32> -> vector<16x128xf32>
    %c0_10 = arith.constant 0 : index
    %c0_11 = arith.constant 0 : index
    %c0_12 = arith.constant 0 : index
    %13 = vector.load %arg5[%c0_10, %c0_11, %c0_12] : memref<2x1x128xf32, #tpu.memory_space<vmem>>, vector<1x1x128xf32>
    %14 = vector.shape_cast %13 : vector<1x1x128xf32> to vector<1x128xf32>
    %15 = vector.broadcast %14 : vector<1x128xf32> to vector<16x128xf32>
    %16 = arith.addf %12, %15 : vector<16x128xf32>
    %cst_13 = arith.constant 0.000000e+00 : f32
    %17 = vector.broadcast %cst_13 : f32 to vector<16x128xf32>
    %18 = arith.maximumf %16, %17 : vector<16x128xf32>
    %19 = arith.truncf %18 : vector<16x128xf32> to vector<16x128xbf16>
    %c1 = arith.constant 1 : index
    %c0_14 = arith.constant 0 : index
    %c0_15 = arith.constant 0 : index
    %20 = vector.load %arg4[%c1, %c0_14, %c0_15] : memref<2x128x128xbf16, #tpu.memory_space<vmem>>, vector<1x128x128xbf16>
    %21 = vector.shape_cast %20 : vector<1x128x128xbf16> to vector<128x128xbf16>
    %cst_16 = arith.constant dense<0.000000e+00> : vector<16x128xf32>
    %22 = tpu.matmul %19, %21, %cst_16 {dimension_numbers = #tpu.dot_dimension_numbers<[1], [0], [0], [1], [0, 0, 1, 1], [], []>} : vector<16x128xbf16>, vector<128x128xbf16>, vector<16x128xf32> -> vector<16x128xf32>
    %c1_17 = arith.constant 1 : index
    %c0_18 = arith.constant 0 : index
    %c0_19 = arith.constant 0 : index
    %23 = vector.load %arg5[%c1_17, %c0_18, %c0_19] : memref<2x1x128xf32, #tpu.memory_space<vmem>>, vector<1x1x128xf32>
    %24 = vector.shape_cast %23 : vector<1x1x128xf32> to vector<1x128xf32>
    %25 = vector.broadcast %24 : vector<1x128xf32> to vector<16x128xf32>
    %26 = arith.addf %22, %25 : vector<16x128xf32>
    %cst_20 = arith.constant 0.000000e+00 : f32
    %27 = vector.broadcast %cst_20 : f32 to vector<16x128xf32>
    %28 = arith.maximumf %26, %27 : vector<16x128xf32>
    %29 = arith.truncf %28 : vector<16x128xf32> to vector<16x128xbf16>
    %c0_21 = arith.constant 0 : index
    %c0_22 = arith.constant 0 : index
    %30 = vector.load %arg6[%c0_21, %c0_22] : memref<128x128xbf16, #tpu.memory_space<vmem>>, vector<128x128xbf16>
    %cst_23 = arith.constant dense<0.000000e+00> : vector<16x128xf32>
    %31 = tpu.matmul %29, %30, %cst_23 {dimension_numbers = #tpu.dot_dimension_numbers<[1], [0], [0], [1], [0, 0, 1, 1], [], []>} : vector<16x128xbf16>, vector<128x128xbf16>, vector<16x128xf32> -> vector<16x128xf32>
    %c0_24 = arith.constant 0 : index
    %c0_25 = arith.constant 0 : index
    %32 = vector.load %arg7[%c0_24, %c0_25] : memref<1x128xf32, #tpu.memory_space<vmem>>, vector<1x128xf32>
    %33 = vector.broadcast %32 : vector<1x128xf32> to vector<16x128xf32>
    %34 = arith.addf %31, %33 : vector<16x128xf32>
    %c0_26 = arith.constant 0 : index
    %c0_27 = arith.constant 0 : index
    %35 = vector.load %arg8[%c0_26, %c0_27] : memref<16x128xf32, #tpu.memory_space<vmem>>, vector<16x128xf32>
    tpu.vector_store %arg8[%c0_26, %c0_27], %34 {strides = array<i32>} : memref<16x128xf32, #tpu.memory_space<vmem>>, vector<16x128xf32>,
    return
  }
  func.func @transform_0(%arg0: i32) -> (i32, i32) {
    %c0_i32 = arith.constant 0 : i32
    %c0_i32_0 = arith.constant 0 : i32
    return %arg0, %c0_i32 : i32, i32
  }
  func.func @transform_1(%arg0: i32) -> (i32, i32) {
    %c0_i32 = arith.constant 0 : i32
    %c0_i32_0 = arith.constant 0 : i32
    %c0_i32_1 = arith.constant 0 : i32
    return %c0_i32, %c0_i32_0 : i32, i32
  }
  func.func @transform_2(%arg0: i32) -> (i32, i32) {
    %c0_i32 = arith.constant 0 : i32
    %c0_i32_0 = arith.constant 0 : i32
    %c0_i32_1 = arith.constant 0 : i32
    return %c0_i32, %c0_i32_0 : i32, i32
  }
  func.func @transform_3(%arg0: i32) -> (i32, i32, i32) {
    %c0_i32 = arith.constant 0 : i32
    %c0_i32_0 = arith.constant 0 : i32
    %c0_i32_1 = arith.constant 0 : i32
    %c0_i32_2 = arith.constant 0 : i32
    return %c0_i32, %c0_i32_0, %c0_i32_1 : i32, i32, i32
  }
  func.func @transform_4(%arg0: i32) -> (i32, i32, i32) {
    %c0_i32 = arith.constant 0 : i32
    %c0_i32_0 = arith.constant 0 : i32
    %c0_i32_1 = arith.constant 0 : i32
    %c0_i32_2 = arith.constant 0 : i32
    return %c0_i32, %c0_i32_0, %c0_i32_1 : i32, i32, i32
  }
  func.func @transform_5(%arg0: i32) -> (i32, i32) {
    %c0_i32 = arith.constant 0 : i32
    %c0_i32_0 = arith.constant 0 : i32
    %c0_i32_1 = arith.constant 0 : i32
    return %c0_i32, %c0_i32_0 : i32, i32
  }
  func.func @transform_6(%arg0: i32) -> (i32, i32) {
    %c0_i32 = arith.constant 0 : i32
    %c0_i32_0 = arith.constant 0 : i32
    %c0_i32_1 = arith.constant 0 : i32
    return %c0_i32, %c0_i32_0 : i32, i32
  }
  func.func @transform_7(%arg0: i32) -> (i32, i32) {
    %c0_i32 = arith.constant 0 : i32
    %c0_i32_0 = arith.constant 0 : i32
    return %arg0, %c0_i32 : i32, i32
  }
}

module attributes {stable_mosaic.version = 11 : i64} {
  func.func @_fused_mlp_kernel(%arg0: i32, %arg1: memref<16x128xf32, #tpu.memory_space<vmem>>, %arg2: memref<128x128xbf16, #tpu.memory_space<vmem>>, %arg3: memref<1x128xf32, #tpu.memory_space<vmem>>, %arg4: memref<2x128x128xbf16, #tpu.memory_space<vmem>>, %arg5: memref<2x1x128xf32, #tpu.memory_space<vmem>>, %arg6: memref<128x128xbf16, #tpu.memory_space<vmem>>, %arg7: memref<1x128xf32, #tpu.memory_space<vmem>>, %arg8: memref<16x128xf32, #tpu.memory_space<vmem>>) attributes {dimension_semantics = [#tpu.dimension_semantics<parallel>], iteration_bounds = array<i64: 1>, scalar_prefetch = 0 : i64, scratch_operands = 0 : i64, tpu.core_type = #tpu.core_type<tc>, window_params = [{transform_indices = @transform_0, window_bounds = array<i64: 16, 128>}, {pipeline_mode = #tpu.pipeline_mode<synchronous>, transform_indices = @transform_1, window_bounds = array<i64: 128, 128>}, {pipeline_mode = #tpu.pipeline_mode<synchronous>, transform_indices = @transform_2, window_bounds = array<i64: 1, 128>}, {pipeline_mode = #tpu.pipeline_mode<synchronous>, transform_indices = @transform_3, window_bounds = array<i64: 2, 128, 128>}, {pipeline_mode = #tpu.pipeline_mode<synchronous>, transform_indices = @transform_4, window_bounds = array<i64: 2, 1, 128>}, {pipeline_mode = #tpu.pipeline_mode<synchronous>, transform_indices = @transform_5, window_bounds = array<i64: 128, 128>}, {pipeline_mode = #tpu.pipeline_mode<synchronous>, transform_indices = @transform_6, window_bounds = array<i64: 1, 128>}, {transform_indices = @transform_7, window_bounds = array<i64: 16, 128>}]} {
    %c0 = arith.constant 0 : index
    %c0_0 = arith.constant 0 : index
    %0 = vector.load %arg1[%c0, %c0_0] : memref<16x128xf32, #tpu.memory_space<vmem>>, vector<16x128xf32>
    %1 = arith.truncf %0 : vector<16x128xf32> to vector<16x128xbf16>
    %c0_1 = arith.constant 0 : index
    %c0_2 = arith.constant 0 : index
    %2 = vector.load %arg2[%c0_1, %c0_2] : memref<128x128xbf16, #tpu.memory_space<vmem>>, vector<128x128xbf16>
    %cst = arith.constant dense<0.000000e+00> : vector<16x128xf32>
    %3 = tpu.matmul %1, %2, %cst {dimension_numbers = #tpu.dot_dimension_numbers<[1], [0], [0], [1], [0, 0, 1, 1], [], []>} : vector<16x128xbf16>, vector<128x128xbf16>, vector<16x128xf32> -> vector<16x128xf32>
    %c0_3 = arith.constant 0 : index
    %c0_4 = arith.constant 0 : index
    %4 = vector.load %arg3[%c0_3, %c0_4] : memref<1x128xf32, #tpu.memory_space<vmem>>, vector<1x128xf32>
    %5 = vector.broadcast %4 : vector<1x128xf32> to vector<16x128xf32>
    %6 = arith.addf %3, %5 : vector<16x128xf32>
    %cst_5 = arith.constant 0.000000e+00 : f32
    %7 = vector.broadcast %cst_5 : f32 to vector<16x128xf32>
    %8 = arith.maximumf %6, %7 : vector<16x128xf32>
    %9 = arith.truncf %8 : vector<16x128xf32> to vector<16x128xbf16>
    %c0_6 = arith.constant 0 : index
    %c0_7 = arith.constant 0 : index
    %c0_8 = arith.constant 0 : index
    %10 = vector.load %arg4[%c0_6, %c0_7, %c0_8] : memref<2x128x128xbf16, #tpu.memory_space<vmem>>, vector<1x128x128xbf16>
    %11 = vector.shape_cast %10 : vector<1x128x128xbf16> to vector<128x128xbf16>
    %cst_9 = arith.constant dense<0.000000e+00> : vector<16x128xf32>
    %12 = tpu.matmul %9, %11, %cst_9 {dimension_numbers = #tpu.dot_dimension_numbers<[1], [0], [0], [1], [0, 0, 1, 1], [], []>} : vector<16x128xbf16>, vector<128x128xbf16>, vector<16x128xf32> -> vector<16x128xf32>
    %c0_10 = arith.constant 0 : index
    %c0_11 = arith.constant 0 : index
    %c0_12 = arith.constant 0 : index
    %13 = vector.load %arg5[%c0_10, %c0_11, %c0_12] : memref<2x1x128xf32, #tpu.memory_space<vmem>>, vector<1x1x128xf32>
    %14 = vector.shape_cast %13 : vector<1x1x128xf32> to vector<1x128xf32>
    %15 = vector.broadcast %14 : vector<1x128xf32> to vector<16x128xf32>
    %16 = arith.addf %12, %15 : vector<16x128xf32>
    %cst_13 = arith.constant 0.000000e+00 : f32
    %17 = vector.broadcast %cst_13 : f32 to vector<16x128xf32>
    %18 = arith.maximumf %16, %17 : vector<16x128xf32>
    %19 = arith.truncf %18 : vector<16x128xf32> to vector<16x128xbf16>
    %c1 = arith.constant 1 : index
    %c0_14 = arith.constant 0 : index
    %c0_15 = arith.constant 0 : index
    %20 = vector.load %arg4[%c1, %c0_14, %c0_15] : memref<2x128x128xbf16, #tpu.memory_space<vmem>>, vector<1x128x128xbf16>
    %21 = vector.shape_cast %20 : vector<1x128x128xbf16> to vector<128x128xbf16>
    %cst_16 = arith.constant dense<0.000000e+00> : vector<16x128xf32>
    %22 = tpu.matmul %19, %21, %cst_16 {dimension_numbers = #tpu.dot_dimension_numbers<[1], [0], [0], [1], [0, 0, 1, 1], [], []>} : vector<16x128xbf16>, vector<128x128xbf16>, vector<16x128xf32> -> vector<16x128xf32>
    %c1_17 = arith.constant 1 : index
    %c0_18 = arith.constant 0 : index
    %c0_19 = arith.constant 0 : index
    %23 = vector.load %arg5[%c1_17, %c0_18, %c0_19] : memref<2x1x128xf32, #tpu.memory_space<vmem>>, vector<1x1x128xf32>
    %24 = vector.shape_cast %23 : vector<1x1x128xf32> to vector<1x128xf32>
    %25 = vector.broadcast %24 : vector<1x128xf32> to vector<16x128xf32>
    %26 = arith.addf %22, %25 : vector<16x128xf32>
    %cst_20 = arith.constant 0.000000e+00 : f32
    %27 = vector.broadcast %cst_20 : f32 to vector<16x128xf32>
    %28 = arith.maximumf %26, %27 : vector<16x128xf32>
    %29 = arith.truncf %28 : vector<16x128xf32> to vector<16x128xbf16>
    %c0_21 = arith.constant 0 : index
    %c0_22 = arith.constant 0 : index
    %30 = vector.load %arg6[%c0_21, %c0_22] : memref<128x128xbf16, #tpu.memory_space<vmem>>, vector<128x128xbf16>
    %cst_23 = arith.constant dense<0.000000e+00> : vector<16x128xf32>
    %31 = tpu.matmul %29, %30, %cst_23 {dimension_numbers = #tpu.dot_dimension_numbers<[1], [0], [0], [1], [0, 0, 1, 1], [], []>} : vector<16x128xbf16>, vector<128x128xbf16>, vector<16x128xf32> -> vector<16x128xf32>
    %c0_24 = arith.constant 0 : index
    %c0_25 = arith.constant 0 : index
    %32 = vector.load %arg7[%c0_24, %c0_25] : memref<1x128xf32, #tpu.memory_space<vmem>>, vector<1x128xf32>
    %33 = vector.broadcast %32 : vector<1x128xf32> to vector<16x128xf32>
    %34 = arith.addf %31, %33 : vector<16x128xf32>
    %c0_26 = arith.constant 0 : index
    %c0_27 = arith.constant 0 : index
    %35 = vector.load %arg8[%c0_26, %c0_27] : memref<16x128xf32, #tpu.memory_space<vmem>>, vector<16x128xf32>
    tpu.vector_store %arg8[%c0_26, %c0_27], %34 {strides = array<i32>} : memref<16x128xf32, #tpu.memory_space<vmem>>, vector<16x128xf32>,
    return
  }
  func.func @transform_0(%arg0: i32) -> (i32, i32) {
    %c0_i32 = arith.constant 0 : i32
    %c0_i32_0 = arith.constant 0 : i32
    return %arg0, %c0_i32 : i32, i32
  }
  func.func @transform_1(%arg0: i32) -> (i32, i32) {
    %c0_i32 = arith.constant 0 : i32
    %c0_i32_0 = arith.constant 0 : i32
    %c0_i32_1 = arith.constant 0 : i32
    return %c0_i32, %c0_i32_0 : i32, i32
  }
  func.func @transform_2(%arg0: i32) -> (i32, i32) {
    %c0_i32 = arith.constant 0 : i32
    %c0_i32_0 = arith.constant 0 : i32
    %c0_i32_1 = arith.constant 0 : i32
    return %c0_i32, %c0_i32_0 : i32, i32
  }
  func.func @transform_3(%arg0: i32) -> (i32, i32, i32) {
    %c0_i32 = arith.constant 0 : i32
    %c0_i32_0 = arith.constant 0 : i32
    %c0_i32_1 = arith.constant 0 : i32
    %c0_i32_2 = arith.constant 0 : i32
    return %c0_i32, %c0_i32_0, %c0_i32_1 : i32, i32, i32
  }
  func.func @transform_4(%arg0: i32) -> (i32, i32, i32) {
    %c0_i32 = arith.constant 0 : i32
    %c0_i32_0 = arith.constant 0 : i32
    %c0_i32_1 = arith.constant 0 : i32
    %c0_i32_2 = arith.constant 0 : i32
    return %c0_i32, %c0_i32_0, %c0_i32_1 : i32, i32, i32
  }
  func.func @transform_5(%arg0: i32) -> (i32, i32) {
    %c0_i32 = arith.constant 0 : i32
    %c0_i32_0 = arith.constant 0 : i32
    %c0_i32_1 = arith.constant 0 : i32
    return %c0_i32, %c0_i32_0 : i32, i32
  }
  func.func @transform_6(%arg0: i32) -> (i32, i32) {
    %c0_i32 = arith.constant 0 : i32
    %c0_i32_0 = arith.constant 0 : i32
    %c0_i32_1 = arith.constant 0 : i32
    return %c0_i32, %c0_i32_0 : i32, i32
  }
  func.func @transform_7(%arg0: i32) -> (i32, i32) {
    %c0_i32 = arith.constant 0 : i32
    %c0_i32_0 = arith.constant 0 : i32
    return %arg0, %c0_i32 : i32, i32
  }
}

</mosaic_0001>

<bundles_post_ra>
// kernel: tpu_custom_call.1
= control target key start
LH: loop header
LB: loop body
LE: loop exit
PB: predicated region body
PF: predicated region fallthrough
CT: control target
= control target key end

     0   :  { %12 = vsyncpa [#allocation3], 0  ;;  %s1065_s0 = inlined_call_operand.hbm [shape: f32[16,128], index: 0, kind: input, shape index: {}]   ;;  %s1066_s1 = inlined_call_operand.hbm [shape: bf16[128,128], index: 1, kind: input, shape index: {}]   ;;  %s1067_s2 = inlined_call_operand.vmem [shape: f32[1,128], index: 2, kind: input, shape index: {}]   ;;  %s1068_s3 = inlined_call_operand.hbm [shape: bf16[2,128,128], index: 3, kind: input, shape index: {}]   ;;  %s1069_s4 = inlined_call_operand.vmem [shape: f32[2,1,128], index: 4, kind: input, shape index: {}]   ;;  %s1070_s5 = inlined_call_operand.hbm [shape: bf16[128,128], index: 5, kind: input, shape index: {}]   ;;  %s1071_s6 = inlined_call_operand.vmem [shape: f32[1,128], index: 6, kind: input, shape index: {}]   ;;  %s1072_s7 = inlined_call_operand.hbm [shape: f32[16,128], index: 7, kind: output, shape index: {}]  }
   0x1   :  { %13 = vsyncpa [#allocation6], 0 }
   0x2   :  { %14 = vsyncpa [#allocation9], 0 }
   0x3   :  { %15 = vsyncpa [#allocation4], 0  ;;  %s880_s24 = smov [#allocation5]   ;;  %s762_s28 = scalar_lea.hbm %s1066_s1, 1024 }
   0x4   :  { %s33_s25 = sshll.u32 %s880_s24, 4  ;;  %p763_p0 = scmp.ne.s32.totalorder %s1066_s1, %s762_s28  ;;  %s34_s25 = int_to_ptr.vmem [resolvable:$true] %s33_s25 }
   0x5   :  { %p766_p1 = scmp.lt.u32.totalorder %s762_s28, %s1066_s1 }
   0x7   :  { %p768_p2 = pnand %p766_p1, %p763_p0 }
   0x9   :  { %771 = shalt.err (!%p768_p2)
}
   0xa   :  { %s772_s10 = scalar_lea.vmem %s34_s25, 1024  ;;  %p777_p4 = scmp.lt.s32.totalorder %s34_s25, %s34_s25 }
   0xb   :  { %p773_p3 = scmp.ne.s32.totalorder %s34_s25, %s772_s10  ;;  %p778_p5 = scmp.lt.s32.totalorder %s772_s10, %s772_s10 }
   0xd   :  { %p779_p6 = por %p778_p5, %p777_p4 }
   0xf   :  { %p780_p7 = pnand %p779_p6, %p773_p3 }
  0x11   :  { %783 = shalt.err (!%p780_p7)
}
  0x12   :  { %s881_s11 = smov 64   ;;  %s882_s12 = smov 4  }
  0x13   :  { %39 = dma.hbm_to_vmem [thread:$0]  %s1066_s1, 1024, %s34_s25, [#allocation6], %s881_s11, %s881_s11, %s882_s12  }
  0x14   :  { %s883_s15 = smov [#allocation2]   ;;  %s784_s19 = scalar_lea.hbm %s1065_s0, 256 }
  0x15   :  { %s21_s16 = sshll.u32 %s883_s15, 4  ;;  %p785_p8 = scmp.ne.s32.totalorder %s1065_s0, %s784_s19  ;;  %s22_s16 = int_to_ptr.vmem [resolvable:$true] %s21_s16 }
  0x16   :  { %p788_p9 = scmp.lt.u32.totalorder %s784_s19, %s1065_s0 }
  0x18   :  { %p790_p10 = pnand %p788_p9, %p785_p8 }
  0x1a   :  { %793 = shalt.err (!%p790_p10)
}
  0x1b   :  { %s794_s24 = scalar_lea.vmem %s22_s16, 256  ;;  %p799_p12 = scmp.lt.s32.totalorder %s22_s16, %s22_s16 }
  0x1c   :  { %p795_p11 = scmp.ne.s32.totalorder %s22_s16, %s794_s24  ;;  %p800_p13 = scmp.lt.s32.totalorder %s794_s24, %s794_s24 }
  0x1e   :  { %p801_p0 = por %p800_p13, %p799_p12 }
  0x20   :  { %p802_p1 = pnand %p801_p0, %p795_p11 }
  0x22   :  { %805 = shalt.err (!%p802_p1)
}
  0x23   :  { %s884_s1 = smov 128   ;;  %s885_s25 = smov 8  }
  0x24   :  { %27 = dma.hbm_to_vmem [thread:$0]  %s1065_s0, 256, %s22_s16, [#allocation3], %s884_s1, %s884_s1, %s885_s25  }
  0x25   :  { %s886_s28 = smov [#allocation7]   ;;  %s887_s30 = smov [#allocation8]  }
  0x26   :  { %s47_s29 = sshll.u32 %s886_s28, 4  ;;  %s61_s8 = sshll.u32 %s887_s30, 4  ;;  %s48_s29 = int_to_ptr.vmem [resolvable:$true] %s47_s29  ;;  %s961_s8 = int_to_ptr.vmem [resolvable:$true] %s61_s8 }
  0x27   :  { %s806_s13 = scalar_lea.hbm %s1068_s3, 2048 }
  0x28   :  { %p807_p2 = scmp.ne.s32.totalorder %s1068_s3, %s806_s13  ;;  %p810_p3 = scmp.lt.u32.totalorder %s806_s13, %s1068_s3 }
  0x2a   :  { %p812_p4 = pnand %p810_p3, %p807_p2 }
  0x2c   :  { %815 = shalt.err (!%p812_p4)
}
  0x2d   :  { %s816_s0 = scalar_lea.vmem %s48_s29, 2048  ;;  %p821_p6 = scmp.lt.s32.totalorder %s48_s29, %s48_s29 }
  0x2e   :  { %p817_p5 = scmp.ne.s32.totalorder %s48_s29, %s816_s0  ;;  %p822_p7 = scmp.lt.s32.totalorder %s816_s0, %s816_s0 }
  0x30   :  { %p823_p8 = por %p822_p7, %p821_p6 }
  0x32   :  { %p824_p9 = pnand %p823_p8, %p817_p5 }
  0x34   :  { %827 = shalt.err (!%p824_p9)
}
  0x35   :  { %53 = dma.hbm_to_vmem [thread:$0]  %s1068_s3, 2048, %s48_s29, [#allocation6], %s881_s11, %s881_s11, %s882_s12  }
  0x36   :  { %s828_s22 = scalar_lea.hbm %s1070_s5, 1024 }
  0x37   :  { %p829_p10 = scmp.ne.s32.totalorder %s1070_s5, %s828_s22  ;;  %p832_p11 = scmp.lt.u32.totalorder %s828_s22, %s1070_s5 }
  0x39   :  { %p834_p12 = pnand %p832_p11, %p829_p10 }
  0x3b   :  { %837 = shalt.err (!%p834_p12)
}
  0x3c   :  { %s838_s28 = scalar_lea.vmem %s961_s8, 1024  ;;  %p843_p0 = scmp.lt.s32.totalorder %s961_s8, %s961_s8 }
  0x3d   :  { %p839_p13 = scmp.ne.s32.totalorder %s961_s8, %s838_s28  ;;  %p844_p1 = scmp.lt.s32.totalorder %s838_s28, %s838_s28 }
  0x3f   :  { %p845_p2 = por %p844_p1, %p843_p0 }
  0x41   :  { %p846_p3 = pnand %p845_p2, %p839_p13 }
  0x43   :  { %849 = shalt.err (!%p846_p3)
}
  0x44   :  { %67 = dma.hbm_to_vmem [thread:$0]  %s1070_s5, 1024, %s961_s8, [#allocation9], %s881_s11, %s881_s11, %s882_s12  }
  0x45   :  { %872 = dma.done.wait [#allocation3], 256  }
  0x46   :  { %873 = vsyncadd [#allocation3], 4294967040 }
  0x47   :  { %874 = dma.done.wait [#allocation6], 3072  }
  0x48   :  { %875 = vsyncadd [#allocation6], 4294964224 }
  0x49   :  { %876 = dma.done.wait [#allocation9], 1024  }
  0x4a   :  { %877 = vsyncadd [#allocation9], 4294966272  ;;  %v888_v0 = vmov 0.0   ;;  %vm889_vm0 = vmmov 0   ;;  %v730_v1 = vld [vmem:[#allocation5] sm:$0xff]   ;;  %v731_v2 = vld [vmem:[#allocation5 + $0x8] sm:$0xff]  }
  0x4b   :  { %639 = vmatprep.subr.bf16.mxu0 %v888_v0  ;;  %655 = vmatprep.mubr.msk.bf16.mxu0 %vm889_vm0, %v888_v0  ;;  %v732_v3 = vld [vmem:[#allocation5 + $0x10] sm:$0xff]   ;;  %v738_v4 = vld [vmem:[#allocation7] sm:$0xff]   ;;  %v733_v5 = vld [vmem:[#allocation5 + $0x18] sm:$0xff]   ;;  %s890_s13 = smov [#allocation10]  }
  0x4c   :  { %659 = vmatprep.subr.bf16.mxu1 %v888_v0  ;;  %675 = vmatprep.mubr.msk.bf16.mxu1 %vm889_vm0, %v888_v0  ;;  %v739_v6 = vld [vmem:[#allocation7 + $0x8] sm:$0xff]   ;;  %v734_v7 = vld [vmem:[#allocation5 + $0x20] sm:$0xff]   ;;  %v740_v8 = vld [vmem:[#allocation7 + $0x10] sm:$0xff]   ;;  %s552_s14 = sshll.u32 %s890_s13, 4  ;;  %s553_s14 = int_to_ptr.vmem [resolvable:$true] %s552_s14 }
  0x4d   :  { %640 = vmatpush3.bf16.msra.mxu0 %v730_v1  ;;  %660 = vmatpush3.bf16.msra.mxu1 %v738_v4  ;;  %v735_v9 = vld [vmem:[#allocation5 + $0x28] sm:$0xff]   ;;  %v741_v10 = vld [vmem:[#allocation7 + $0x18] sm:$0xff]   ;;  %v736_v11 = vld [vmem:[#allocation5 + $0x30] sm:$0xff]   ;;  %p855_p5 = scmp.lt.s32.totalorder %s553_s14, %s553_s14 }
  0x4e   :  { %641 = vmatprep.subr.bf16.mxu0 %v888_v0  ;;  %661 = vmatprep.subr.bf16.mxu1 %v888_v0  ;;  %v742_v12 = vld [vmem:[#allocation7 + $0x20] sm:$0xff]   ;;  %v737_v13 = vld [vmem:[#allocation5 + $0x38] sm:$0xff]   ;;  %v83_v14 = vld [vmem:[#allocation2] sm:$0xff] }
  0x4f   :  { %v84_v15 = vld [vmem:[#allocation2 + $0x8] sm:$0xff]  ;;  %v743_v16 = vld [vmem:[#allocation7 + $0x28] sm:$0xff]   ;;  %v744_v18 = vld [vmem:[#allocation7 + $0x30] sm:$0xff]  }
  0x50   :  { %v85_v17 = vpack.c.bf16 %v84_v15, %v83_v14  ;;  %v745_v19 = vld [vmem:[#allocation7 + $0x38] sm:$0xff]   ;;  %v746_v20 = vld [vmem:[#allocation7 + $0x40] sm:$0xff]   ;;  %v747_v21 = vld [vmem:[#allocation7 + $0x48] sm:$0xff]  }
  0x51   :  { %642 = vmatpush3.bf16.msra.mxu0 %v731_v2  ;;  %662 = vmatpush3.bf16.msra.mxu1 %v739_v6  ;;  %v748_v22 = vld [vmem:[#allocation7 + $0x50] sm:$0xff]   ;;  %v749_v23 = vld [vmem:[#allocation7 + $0x58] sm:$0xff]   ;;  %v750_v24 = vld [vmem:[#allocation7 + $0x60] sm:$0xff]  }
  0x52   :  { %643 = vmatprep.subr.bf16.mxu0 %v888_v0  ;;  %663 = vmatprep.subr.bf16.mxu1 %v888_v0  ;;  %v751_v25 = vld [vmem:[#allocation7 + $0x68] sm:$0xff]   ;;  %v566_v26 = vld [vmem:[%s1067_s2] ss:$0 sm:$0xff]  ;;  %v753_v37 = vld [vmem:[#allocation7 + $0x78] sm:$0xff]  }
  0x53   :  { %v752_v36 = vld [vmem:[#allocation7 + $0x70] sm:$0xff]   ;;  %v754_v38 = vld [vmem:[#allocation8] sm:$0xff]   ;;  %v755_v39 = vld [vmem:[#allocation8 + $0x8] sm:$0xff]  }
  0x54   :  { %v756_v40 = vld [vmem:[#allocation8 + $0x10] sm:$0xff]   ;;  %v757_v41 = vld [vmem:[#allocation8 + $0x18] sm:$0xff]   ;;  %v758_v42 = vld [vmem:[#allocation8 + $0x20] sm:$0xff]  }
  0x55   :  { %644 = vmatpush3.bf16.msra.mxu0 %v732_v3  ;;  %664 = vmatpush3.bf16.msra.mxu1 %v740_v8  ;;  %v759_v43 = vld [vmem:[#allocation8 + $0x28] sm:$0xff]   ;;  %v575_v44 = vld [vmem:[%s1069_s4] ss:$0 sm:$0xff]  ;;  %v761_v55 = vld [vmem:[#allocation8 + $0x38] sm:$0xff]  }
  0x56   :  { %645 = vmatprep.subr.bf16.mxu0 %v888_v0  ;;  %665 = vmatprep.subr.bf16.mxu1 %v888_v0  ;;  %v760_v54 = vld [vmem:[#allocation8 + $0x30] sm:$0xff]  }
  0x57   :  { %v585_v56 = vld [vmem:[%s1069_s4 + $0x1] ss:$0 sm:$0xff]  ;;  %s850_s4 = scalar_lea.vmem %s553_s14, 256 }
  0x58   :  { %p851_p4 = scmp.ne.s32.totalorder %s553_s14, %s850_s4  ;;  %p856_p6 = scmp.lt.s32.totalorder %s850_s4, %s850_s4 }
  0x59   :  { %646 = vmatpush3.bf16.msra.mxu0 %v733_v5  ;;  %666 = vmatpush3.bf16.msra.mxu1 %v741_v10 }
  0x5a   :  { %647 = vmatprep.subr.bf16.mxu0 %v888_v0  ;;  %667 = vmatprep.subr.bf16.mxu1 %v888_v0  ;;  %p857_p7 = por %p856_p6, %p855_p5 }
  0x5c   :  { %p858_p8 = pnand %p857_p7, %p851_p4 }
  0x5d   :  { %648 = vmatpush3.bf16.msra.mxu0 %v734_v7  ;;  %668 = vmatpush3.bf16.msra.mxu1 %v742_v12 }
  0x5e   :  { %649 = vmatprep.subr.bf16.mxu0 %v888_v0  ;;  %669 = vmatprep.subr.bf16.mxu1 %v888_v0 }
  0x61   :  { %650 = vmatpush3.bf16.msra.mxu0 %v735_v9  ;;  %670 = vmatpush3.bf16.msra.mxu1 %v743_v16 }
  0x62   :  { %651 = vmatprep.subr.bf16.mxu0 %v888_v0  ;;  %671 = vmatprep.subr.bf16.mxu1 %v888_v0 }
  0x65   :  { %652 = vmatpush3.bf16.msra.mxu0 %v736_v11  ;;  %672 = vmatpush3.bf16.msra.mxu1 %v744_v18 }
  0x66   :  { %653 = vmatprep.subr.bf16.mxu0 %v888_v0  ;;  %673 = vmatprep.subr.bf16.mxu1 %v888_v0 }
  0x69   :  { %654 = vmatpush3.bf16.msra.mxu0 %v737_v13  ;;  %674 = vmatpush3.bf16.msra.mxu1 %v745_v19 }
  0x6a   :  { %679 = vmatprep.subr.bf16.mxu0 %v888_v0  ;;  %699 = vmatprep.subr.bf16.mxu1 %v888_v0 }
  0x6c   :  { %656 = vmatmul.mubr.bf16.vlgmr.msra.gmra.mrb[0].mxu0 %v85_v17 }
  0x6d   :  { %695 = vmatprep.mubr.msk.bf16.mxu0 %vm889_vm0, %v888_v0  ;;  %680 = vmatpush3.bf16.msra.mxu0 %v746_v20 }
  0x6e   :  { %681 = vmatprep.subr.bf16.mxu0 %v888_v0 }
  0x71   :  { %682 = vmatpush3.bf16.msra.mxu0 %v747_v21 }
  0x72   :  { %683 = vmatprep.subr.bf16.mxu0 %v888_v0 }
  0x75   :  { %684 = vmatpush3.bf16.msra.mxu0 %v748_v22 }
  0x76   :  { %685 = vmatprep.subr.bf16.mxu0 %v888_v0 }
  0x79   :  { %686 = vmatpush3.bf16.msra.mxu0 %v749_v23 }
  0x7a   :  { %687 = vmatprep.subr.bf16.mxu0 %v888_v0 }
  0x7d   :  { %688 = vmatpush3.bf16.msra.mxu0 %v750_v24 }
  0x7e   :  { %689 = vmatprep.subr.bf16.mxu0 %v888_v0 }
  0x81   :  { %690 = vmatpush3.bf16.msra.mxu0 %v751_v25 }
  0x82   :  { %691 = vmatprep.subr.bf16.mxu0 %v888_v0 }
  0x85   :  { %692 = vmatpush3.bf16.msra.mxu0 %v752_v36 }
  0x86   :  { %693 = vmatprep.subr.bf16.mxu0 %v888_v0 }
  0x89   :  { %694 = vmatpush3.bf16.msra.mxu0 %v753_v37 }
 0x13f   :  { %v191_v27 = vpop.f32.mrb[0].mxu0 }
 0x140   :  { %v192_v28 = vadd.f32 %v566_v26, %v191_v27  ;;  %v657_v29 = vpop.f32.mrb[1].mxu0 }
 0x141   :  { %v194_v30 = vpop.f32.mrb[2].mxu0 }
 0x142   :  { %v195_v31 = vadd.f32 %v566_v26, %v194_v30  ;;  %v658_v32 = vpop.f32.mrb[3].mxu0  ;;  %v198_v33 = vmax.f32 %v192_v28, 0.0 }
 0x144   :  { %v199_v34 = vmax.f32 %v195_v31, 0.0 }
 0x146   :  { %v200_v35 = vpack.c.bf16 %v199_v34, %v198_v33 }
 0x148   :  { %676 = vmatmul.mubr.bf16.vlgmr.msra.gmra.mrb[0].mxu1 %v200_v35 }
 0x149   :  { %715 = vmatprep.mubr.msk.bf16.mxu1 %vm889_vm0, %v888_v0  ;;  %700 = vmatpush3.bf16.msra.mxu1 %v754_v38 }
 0x14a   :  { %701 = vmatprep.subr.bf16.mxu1 %v888_v0 }
 0x14d   :  { %702 = vmatpush3.bf16.msra.mxu1 %v755_v39 }
 0x14e   :  { %703 = vmatprep.subr.bf16.mxu1 %v888_v0 }
 0x151   :  { %704 = vmatpush3.bf16.msra.mxu1 %v756_v40 }
 0x152   :  { %705 = vmatprep.subr.bf16.mxu1 %v888_v0 }
 0x155   :  { %706 = vmatpush3.bf16.msra.mxu1 %v757_v41 }
 0x156   :  { %707 = vmatprep.subr.bf16.mxu1 %v888_v0 }
 0x159   :  { %708 = vmatpush3.bf16.msra.mxu1 %v758_v42 }
 0x15a   :  { %709 = vmatprep.subr.bf16.mxu1 %v888_v0 }
 0x15d   :  { %710 = vmatpush3.bf16.msra.mxu1 %v759_v43 }
 0x15e   :  { %711 = vmatprep.subr.bf16.mxu1 %v888_v0 }
 0x161   :  { %712 = vmatpush3.bf16.msra.mxu1 %v760_v54 }
 0x162   :  { %713 = vmatprep.subr.bf16.mxu1 %v888_v0  ;;  %v594_v0 = vld [vmem:[%s1071_s6] ss:$0 sm:$0xff] }
 0x165   :  { %714 = vmatpush3.bf16.msra.mxu1 %v761_v55 }
 0x21b   :  { %v306_v45 = vpop.f32.mrb[0].mxu1 }
 0x21c   :  { %v307_v46 = vadd.f32 %v575_v44, %v306_v45  ;;  %v677_v47 = vpop.f32.mrb[1].mxu1 }
 0x21d   :  { %v309_v48 = vpop.f32.mrb[2].mxu1 }
 0x21e   :  { %v310_v49 = vadd.f32 %v575_v44, %v309_v48  ;;  %v678_v50 = vpop.f32.mrb[3].mxu1  ;;  %v313_v51 = vmax.f32 %v307_v46, 0.0 }
 0x220   :  { %v314_v52 = vmax.f32 %v310_v49, 0.0 }
 0x222   :  { %v315_v53 = vpack.c.bf16 %v314_v52, %v313_v51 }
 0x224   :  { %696 = vmatmul.mubr.bf16.vlgmr.msra.gmra.mrb[4].mxu0 %v315_v53 }
 0x2f7   :  { %v423_v57 = vpop.f32.mrb[4].mxu0 }
 0x2f8   :  { %v424_v58 = vadd.f32 %v585_v56, %v423_v57  ;;  %v697_v59 = vpop.f32.mrb[5].mxu0 }
 0x2f9   :  { %v426_v60 = vpop.f32.mrb[6].mxu0 }
 0x2fa   :  { %v427_v61 = vadd.f32 %v585_v56, %v426_v60  ;;  %v698_v62 = vpop.f32.mrb[7].mxu0  ;;  %v430_v63 = vmax.f32 %v424_v58, 0.0 }
 0x2fc   :  { %v431_v1 = vmax.f32 %v427_v61, 0.0 }
 0x2fe   :  { %v432_v2 = vpack.c.bf16 %v431_v1, %v430_v63 }
 0x300   :  { %716 = vmatmul.mubr.bf16.vlgmr.msra.gmra.mrb[4].mxu1 %v432_v2 }
 0x3d3   :  { %v538_v3 = vpop.f32.mrb[4].mxu1 }
 0x3d4   :  { %v539_v4 = vadd.f32 %v594_v0, %v538_v3  ;;  %v717_v5 = vpop.f32.mrb[5].mxu1 }
 0x3d5   :  { %v541_v6 = vpop.f32.mrb[6].mxu1 }
 0x3d6   :  { %545 = vst [vmem:[#allocation10] sm:$0xff] %v539_v4  ;;  %v542_v7 = vadd.f32 %v594_v0, %v541_v6  ;;  %v718_v8 = vpop.f32.mrb[7].mxu1 }
 0x3d8   :  { %546 = vst [vmem:[#allocation10 + $0x8] sm:$0xff] %v542_v7 }
 0x3d9   :  { %861 = shalt.err (!%p858_p8)
}
 0x3da   :  { %s862_s17 = scalar_lea.hbm %s1072_s7, 256 }
 0x3db   :  { %p863_p9 = scmp.ne.s32.totalorder %s1072_s7, %s862_s17  ;;  %p866_p10 = scmp.lt.u32.totalorder %s862_s17, %s1072_s7 }
 0x3dd   :  { %p868_p11 = pnand %p866_p10, %p863_p9 }
 0x3df   :  { %871 = shalt.err (!%p868_p11)
}
 0x3e0   :  { %558 = dma.vmem_to_hbm [thread:$0]  %s553_s14, 256, %s1072_s7, [#allocation4], %s884_s1, %s884_s1, %s885_s25  }
 0x3e1   :  { %878 = dma.done.wait [#allocation4], 256  }
 0x3e2   :  { %879 = vsyncadd [#allocation4], 4294967040 }
 0x3e3   :  { %562 = vsyncpa [#allocation3], 1 }
 0x3e4   :  { %563 = vsyncpa [#allocation6], 1 }
 0x3e5   :  { %564 = vsyncpa [#allocation9], 1 }
 0x3e6   :  { %565 = vsyncpa [#allocation4], 1 }

// kernel: tpu_custom_call.1
= control target key start
LH: loop header
LB: loop body
LE: loop exit
PB: predicated region body
PF: predicated region fallthrough
CT: control target
= control target key end

     0   :  { %12 = vsyncpa [#allocation3], 0  ;;  %s1065_s0 = inlined_call_operand.hbm [shape: f32[16,128], index: 0, kind: input, shape index: {}]   ;;  %s1066_s1 = inlined_call_operand.hbm [shape: bf16[128,128], index: 1, kind: input, shape index: {}]   ;;  %s1067_s2 = inlined_call_operand.vmem [shape: f32[1,128], index: 2, kind: input, shape index: {}]   ;;  %s1068_s3 = inlined_call_operand.hbm [shape: bf16[2,128,128], index: 3, kind: input, shape index: {}]   ;;  %s1069_s4 = inlined_call_operand.vmem [shape: f32[2,1,128], index: 4, kind: input, shape index: {}]   ;;  %s1070_s5 = inlined_call_operand.hbm [shape: bf16[128,128], index: 5, kind: input, shape index: {}]   ;;  %s1071_s6 = inlined_call_operand.vmem [shape: f32[1,128], index: 6, kind: input, shape index: {}]   ;;  %s1072_s7 = inlined_call_operand.hbm [shape: f32[16,128], index: 7, kind: output, shape index: {}]  }
   0x1   :  { %13 = vsyncpa [#allocation6], 0 }
   0x2   :  { %14 = vsyncpa [#allocation9], 0 }
   0x3   :  { %15 = vsyncpa [#allocation4], 0  ;;  %s880_s24 = smov [#allocation5]   ;;  %s762_s28 = scalar_lea.hbm %s1066_s1, 1024 }
   0x4   :  { %s33_s25 = sshll.u32 %s880_s24, 4  ;;  %p763_p0 = scmp.ne.s32.totalorder %s1066_s1, %s762_s28  ;;  %s34_s25 = int_to_ptr.vmem [resolvable:$true] %s33_s25 }
   0x5   :  { %p766_p1 = scmp.lt.u32.totalorder %s762_s28, %s1066_s1 }
   0x7   :  { %p768_p2 = pnand %p766_p1, %p763_p0 }
   0x9   :  { %771 = shalt.err (!%p768_p2)
}
   0xa   :  { %s772_s10 = scalar_lea.vmem %s34_s25, 1024  ;;  %p777_p4 = scmp.lt.s32.totalorder %s34_s25, %s34_s25 }
   0xb   :  { %p773_p3 = scmp.ne.s32.totalorder %s34_s25, %s772_s10  ;;  %p778_p5 = scmp.lt.s32.totalorder %s772_s10, %s772_s10 }
   0xd   :  { %p779_p6 = por %p778_p5, %p777_p4 }
   0xf   :  { %p780_p7 = pnand %p779_p6, %p773_p3 }
  0x11   :  { %783 = shalt.err (!%p780_p7)
}
  0x12   :  { %s881_s11 = smov 64   ;;  %s882_s12 = smov 4  }
  0x13   :  { %39 = dma.hbm_to_vmem [thread:$0]  %s1066_s1, 1024, %s34_s25, [#allocation6], %s881_s11, %s881_s11, %s882_s12  }
  0x14   :  { %s883_s15 = smov [#allocation2]   ;;  %s784_s19 = scalar_lea.hbm %s1065_s0, 256 }
  0x15   :  { %s21_s16 = sshll.u32 %s883_s15, 4  ;;  %p785_p8 = scmp.ne.s32.totalorder %s1065_s0, %s784_s19  ;;  %s22_s16 = int_to_ptr.vmem [resolvable:$true] %s21_s16 }
  0x16   :  { %p788_p9 = scmp.lt.u32.totalorder %s784_s19, %s1065_s0 }
  0x18   :  { %p790_p10 = pnand %p788_p9, %p785_p8 }
  0x1a   :  { %793 = shalt.err (!%p790_p10)
}
  0x1b   :  { %s794_s24 = scalar_lea.vmem %s22_s16, 256  ;;  %p799_p12 = scmp.lt.s32.totalorder %s22_s16, %s22_s16 }
  0x1c   :  { %p795_p11 = scmp.ne.s32.totalorder %s22_s16, %s794_s24  ;;  %p800_p13 = scmp.lt.s32.totalorder %s794_s24, %s794_s24 }
  0x1e   :  { %p801_p0 = por %p800_p13, %p799_p12 }
  0x20   :  { %p802_p1 = pnand %p801_p0, %p795_p11 }
  0x22   :  { %805 = shalt.err (!%p802_p1)
}
  0x23   :  { %s884_s1 = smov 128   ;;  %s885_s25 = smov 8  }
  0x24   :  { %27 = dma.hbm_to_vmem [thread:$0]  %s1065_s0, 256, %s22_s16, [#allocation3], %s884_s1, %s884_s1, %s885_s25  }
  0x25   :  { %s886_s28 = smov [#allocation7]   ;;  %s887_s30 = smov [#allocation8]  }
  0x26   :  { %s47_s29 = sshll.u32 %s886_s28, 4  ;;  %s61_s8 = sshll.u32 %s887_s30, 4  ;;  %s48_s29 = int_to_ptr.vmem [resolvable:$true] %s47_s29  ;;  %s961_s8 = int_to_ptr.vmem [resolvable:$true] %s61_s8 }
  0x27   :  { %s806_s13 = scalar_lea.hbm %s1068_s3, 2048 }
  0x28   :  { %p807_p2 = scmp.ne.s32.totalorder %s1068_s3, %s806_s13  ;;  %p810_p3 = scmp.lt.u32.totalorder %s806_s13, %s1068_s3 }
  0x2a   :  { %p812_p4 = pnand %p810_p3, %p807_p2 }
  0x2c   :  { %815 = shalt.err (!%p812_p4)
}
  0x2d   :  { %s816_s0 = scalar_lea.vmem %s48_s29, 2048  ;;  %p821_p6 = scmp.lt.s32.totalorder %s48_s29, %s48_s29 }
  0x2e   :  { %p817_p5 = scmp.ne.s32.totalorder %s48_s29, %s816_s0  ;;  %p822_p7 = scmp.lt.s32.totalorder %s816_s0, %s816_s0 }
  0x30   :  { %p823_p8 = por %p822_p7, %p821_p6 }
  0x32   :  { %p824_p9 = pnand %p823_p8, %p817_p5 }
  0x34   :  { %827 = shalt.err (!%p824_p9)
}
  0x35   :  { %53 = dma.hbm_to_vmem [thread:$0]  %s1068_s3, 2048, %s48_s29, [#allocation6], %s881_s11, %s881_s11, %s882_s12  }
  0x36   :  { %s828_s22 = scalar_lea.hbm %s1070_s5, 1024 }
  0x37   :  { %p829_p10 = scmp.ne.s32.totalorder %s1070_s5, %s828_s22  ;;  %p832_p11 = scmp.lt.u32.totalorder %s828_s22, %s1070_s5 }
  0x39   :  { %p834_p12 = pnand %p832_p11, %p829_p10 }
  0x3b   :  { %837 = shalt.err (!%p834_p12)
}
  0x3c   :  { %s838_s28 = scalar_lea.vmem %s961_s8, 1024  ;;  %p843_p0 = scmp.lt.s32.totalorder %s961_s8, %s961_s8 }
  0x3d   :  { %p839_p13 = scmp.ne.s32.totalorder %s961_s8, %s838_s28  ;;  %p844_p1 = scmp.lt.s32.totalorder %s838_s28, %s838_s28 }
  0x3f   :  { %p845_p2 = por %p844_p1, %p843_p0 }
  0x41   :  { %p846_p3 = pnand %p845_p2, %p839_p13 }
  0x43   :  { %849 = shalt.err (!%p846_p3)
}
  0x44   :  { %67 = dma.hbm_to_vmem [thread:$0]  %s1070_s5, 1024, %s961_s8, [#allocation9], %s881_s11, %s881_s11, %s882_s12  }
  0x45   :  { %872 = dma.done.wait [#allocation3], 256  }
  0x46   :  { %873 = vsyncadd [#allocation3], 4294967040 }
  0x47   :  { %874 = dma.done.wait [#allocation6], 3072  }
  0x48   :  { %875 = vsyncadd [#allocation6], 4294964224 }
  0x49   :  { %876 = dma.done.wait [#allocation9], 1024  }
  0x4a   :  { %877 = vsyncadd [#allocation9], 4294966272  ;;  %v888_v0 = vmov 0.0   ;;  %vm889_vm0 = vmmov 0   ;;  %v730_v1 = vld [vmem:[#allocation5] sm:$0xff]   ;;  %v731_v2 = vld [vmem:[#allocation5 + $0x8] sm:$0xff]  }
  0x4b   :  { %639 = vmatprep.subr.bf16.mxu0 %v888_v0  ;;  %655 = vmatprep.mubr.msk.bf16.mxu0 %vm889_vm0, %v888_v0  ;;  %v732_v3 = vld [vmem:[#allocation5 + $0x10] sm:$0xff]   ;;  %v738_v4 = vld [vmem:[#allocation7] sm:$0xff]   ;;  %v733_v5 = vld [vmem:[#allocation5 + $0x18] sm:$0xff]   ;;  %s890_s13 = smov [#allocation10]  }
  0x4c   :  { %659 = vmatprep.subr.bf16.mxu1 %v888_v0  ;;  %675 = vmatprep.mubr.msk.bf16.mxu1 %vm889_vm0, %v888_v0  ;;  %v739_v6 = vld [vmem:[#allocation7 + $0x8] sm:$0xff]   ;;  %v734_v7 = vld [vmem:[#allocation5 + $0x20] sm:$0xff]   ;;  %v740_v8 = vld [vmem:[#allocation7 + $0x10] sm:$0xff]   ;;  %s552_s14 = sshll.u32 %s890_s13, 4  ;;  %s553_s14 = int_to_ptr.vmem [resolvable:$true] %s552_s14 }
  0x4d   :  { %640 = vmatpush3.bf16.msra.mxu0 %v730_v1  ;;  %660 = vmatpush3.bf16.msra.mxu1 %v738_v4  ;;  %v735_v9 = vld [vmem:[#allocation5 + $0x28] sm:$0xff]   ;;  %v741_v10 = vld [vmem:[#allocation7 + $0x18] sm:$0xff]   ;;  %v736_v11 = vld [vmem:[#allocation5 + $0x30] sm:$0xff]   ;;  %p855_p5 = scmp.lt.s32.totalorder %s553_s14, %s553_s14 }
  0x4e   :  { %641 = vmatprep.subr.bf16.mxu0 %v888_v0  ;;  %661 = vmatprep.subr.bf16.mxu1 %v888_v0  ;;  %v742_v12 = vld [vmem:[#allocation7 + $0x20] sm:$0xff]   ;;  %v737_v13 = vld [vmem:[#allocation5 + $0x38] sm:$0xff]   ;;  %v83_v14 = vld [vmem:[#allocation2] sm:$0xff] }
  0x4f   :  { %v84_v15 = vld [vmem:[#allocation2 + $0x8] sm:$0xff]  ;;  %v743_v16 = vld [vmem:[#allocation7 + $0x28] sm:$0xff]   ;;  %v744_v18 = vld [vmem:[#allocation7 + $0x30] sm:$0xff]  }
  0x50   :  { %v85_v17 = vpack.c.bf16 %v84_v15, %v83_v14  ;;  %v745_v19 = vld [vmem:[#allocation7 + $0x38] sm:$0xff]   ;;  %v746_v20 = vld [vmem:[#allocation7 + $0x40] sm:$0xff]   ;;  %v747_v21 = vld [vmem:[#allocation7 + $0x48] sm:$0xff]  }
  0x51   :  { %642 = vmatpush3.bf16.msra.mxu0 %v731_v2  ;;  %662 = vmatpush3.bf16.msra.mxu1 %v739_v6  ;;  %v748_v22 = vld [vmem:[#allocation7 + $0x50] sm:$0xff]   ;;  %v749_v23 = vld [vmem:[#allocation7 + $0x58] sm:$0xff]   ;;  %v750_v24 = vld [vmem:[#allocation7 + $0x60] sm:$0xff]  }
  0x52   :  { %643 = vmatprep.subr.bf16.mxu0 %v888_v0  ;;  %663 = vmatprep.subr.bf16.mxu1 %v888_v0  ;;  %v751_v25 = vld [vmem:[#allocation7 + $0x68] sm:$0xff]   ;;  %v566_v26 = vld [vmem:[%s1067_s2] ss:$0 sm:$0xff]  ;;  %v753_v37 = vld [vmem:[#allocation7 + $0x78] sm:$0xff]  }
  0x53   :  { %v752_v36 = vld [vmem:[#allocation7 + $0x70] sm:$0xff]   ;;  %v754_v38 = vld [vmem:[#allocation8] sm:$0xff]   ;;  %v755_v39 = vld [vmem:[#allocation8 + $0x8] sm:$0xff]  }
  0x54   :  { %v756_v40 = vld [vmem:[#allocation8 + $0x10] sm:$0xff]   ;;  %v757_v41 = vld [vmem:[#allocation8 + $0x18] sm:$0xff]   ;;  %v758_v42 = vld [vmem:[#allocation8 + $0x20] sm:$0xff]  }
  0x55   :  { %644 = vmatpush3.bf16.msra.mxu0 %v732_v3  ;;  %664 = vmatpush3.bf16.msra.mxu1 %v740_v8  ;;  %v759_v43 = vld [vmem:[#allocation8 + $0x28] sm:$0xff]   ;;  %v575_v44 = vld [vmem:[%s1069_s4] ss:$0 sm:$0xff]  ;;  %v761_v55 = vld [vmem:[#allocation8 + $0x38] sm:$0xff]  }
  0x56   :  { %645 = vmatprep.subr.bf16.mxu0 %v888_v0  ;;  %665 = vmatprep.subr.bf16.mxu1 %v888_v0  ;;  %v760_v54 = vld [vmem:[#allocation8 + $0x30] sm:$0xff]  }
  0x57   :  { %v585_v56 = vld [vmem:[%s1069_s4 + $0x1] ss:$0 sm:$0xff]  ;;  %s850_s4 = scalar_lea.vmem %s553_s14, 256 }
  0x58   :  { %p851_p4 = scmp.ne.s32.totalorder %s553_s14, %s850_s4  ;;  %p856_p6 = scmp.lt.s32.totalorder %s850_s4, %s850_s4 }
  0x59   :  { %646 = vmatpush3.bf16.msra.mxu0 %v733_v5  ;;  %666 = vmatpush3.bf16.msra.mxu1 %v741_v10 }
  0x5a   :  { %647 = vmatprep.subr.bf16.mxu0 %v888_v0  ;;  %667 = vmatprep.subr.bf16.mxu1 %v888_v0  ;;  %p857_p7 = por %p856_p6, %p855_p5 }
  0x5c   :  { %p858_p8 = pnand %p857_p7, %p851_p4 }
  0x5d   :  { %648 = vmatpush3.bf16.msra.mxu0 %v734_v7  ;;  %668 = vmatpush3.bf16.msra.mxu1 %v742_v12 }
  0x5e   :  { %649 = vmatprep.subr.bf16.mxu0 %v888_v0  ;;  %669 = vmatprep.subr.bf16.mxu1 %v888_v0 }
  0x61   :  { %650 = vmatpush3.bf16.msra.mxu0 %v735_v9  ;;  %670 = vmatpush3.bf16.msra.mxu1 %v743_v16 }
  0x62   :  { %651 = vmatprep.subr.bf16.mxu0 %v888_v0  ;;  %671 = vmatprep.subr.bf16.mxu1 %v888_v0 }
  0x65   :  { %652 = vmatpush3.bf16.msra.mxu0 %v736_v11  ;;  %672 = vmatpush3.bf16.msra.mxu1 %v744_v18 }
  0x66   :  { %653 = vmatprep.subr.bf16.mxu0 %v888_v0  ;;  %673 = vmatprep.subr.bf16.mxu1 %v888_v0 }
  0x69   :  { %654 = vmatpush3.bf16.msra.mxu0 %v737_v13  ;;  %674 = vmatpush3.bf16.msra.mxu1 %v745_v19 }
  0x6a   :  { %679 = vmatprep.subr.bf16.mxu0 %v888_v0  ;;  %699 = vmatprep.subr.bf16.mxu1 %v888_v0 }
  0x6c   :  { %656 = vmatmul.mubr.bf16.vlgmr.msra.gmra.mrb[0].mxu0 %v85_v17 }
  0x6d   :  { %695 = vmatprep.mubr.msk.bf16.mxu0 %vm889_vm0, %v888_v0  ;;  %680 = vmatpush3.bf16.msra.mxu0 %v746_v20 }
  0x6e   :  { %681 = vmatprep.subr.bf16.mxu0 %v888_v0 }
  0x71   :  { %682 = vmatpush3.bf16.msra.mxu0 %v747_v21 }
  0x72   :  { %683 = vmatprep.subr.bf16.mxu0 %v888_v0 }
  0x75   :  { %684 = vmatpush3.bf16.msra.mxu0 %v748_v22 }
  0x76   :  { %685 = vmatprep.subr.bf16.mxu0 %v888_v0 }
  0x79   :  { %686 = vmatpush3.bf16.msra.mxu0 %v749_v23 }
  0x7a   :  { %687 = vmatprep.subr.bf16.mxu0 %v888_v0 }
  0x7d   :  { %688 = vmatpush3.bf16.msra.mxu0 %v750_v24 }
  0x7e   :  { %689 = vmatprep.subr.bf16.mxu0 %v888_v0 }
  0x81   :  { %690 = vmatpush3.bf16.msra.mxu0 %v751_v25 }
  0x82   :  { %691 = vmatprep.subr.bf16.mxu0 %v888_v0 }
  0x85   :  { %692 = vmatpush3.bf16.msra.mxu0 %v752_v36 }
  0x86   :  { %693 = vmatprep.subr.bf16.mxu0 %v888_v0 }
  0x89   :  { %694 = vmatpush3.bf16.msra.mxu0 %v753_v37 }
 0x13f   :  { %v191_v27 = vpop.f32.mrb[0].mxu0 }
 0x140   :  { %v192_v28 = vadd.f32 %v566_v26, %v191_v27  ;;  %v657_v29 = vpop.f32.mrb[1].mxu0 }
 0x141   :  { %v194_v30 = vpop.f32.mrb[2].mxu0 }
 0x142   :  { %v195_v31 = vadd.f32 %v566_v26, %v194_v30  ;;  %v658_v32 = vpop.f32.mrb[3].mxu0  ;;  %v198_v33 = vmax.f32 %v192_v28, 0.0 }
 0x144   :  { %v199_v34 = vmax.f32 %v195_v31, 0.0 }
 0x146   :  { %v200_v35 = vpack.c.bf16 %v199_v34, %v198_v33 }
 0x148   :  { %676 = vmatmul.mubr.bf16.vlgmr.msra.gmra.mrb[0].mxu1 %v200_v35 }
 0x149   :  { %715 = vmatprep.mubr.msk.bf16.mxu1 %vm889_vm0, %v888_v0  ;;  %700 = vmatpush3.bf16.msra.mxu1 %v754_v38 }
 0x14a   :  { %701 = vmatprep.subr.bf16.mxu1 %v888_v0 }
 0x14d   :  { %702 = vmatpush3.bf16.msra.mxu1 %v755_v39 }
 0x14e   :  { %703 = vmatprep.subr.bf16.mxu1 %v888_v0 }
 0x151   :  { %704 = vmatpush3.bf16.msra.mxu1 %v756_v40 }
 0x152   :  { %705 = vmatprep.subr.bf16.mxu1 %v888_v0 }
 0x155   :  { %706 = vmatpush3.bf16.msra.mxu1 %v757_v41 }
 0x156   :  { %707 = vmatprep.subr.bf16.mxu1 %v888_v0 }
 0x159   :  { %708 = vmatpush3.bf16.msra.mxu1 %v758_v42 }
 0x15a   :  { %709 = vmatprep.subr.bf16.mxu1 %v888_v0 }
 0x15d   :  { %710 = vmatpush3.bf16.msra.mxu1 %v759_v43 }
 0x15e   :  { %711 = vmatprep.subr.bf16.mxu1 %v888_v0 }
 0x161   :  { %712 = vmatpush3.bf16.msra.mxu1 %v760_v54 }
 0x162   :  { %713 = vmatprep.subr.bf16.mxu1 %v888_v0  ;;  %v594_v0 = vld [vmem:[%s1071_s6] ss:$0 sm:$0xff] }
 0x165   :  { %714 = vmatpush3.bf16.msra.mxu1 %v761_v55 }
 0x21b   :  { %v306_v45 = vpop.f32.mrb[0].mxu1 }
 0x21c   :  { %v307_v46 = vadd.f32 %v575_v44, %v306_v45  ;;  %v677_v47 = vpop.f32.mrb[1].mxu1 }
 0x21d   :  { %v309_v48 = vpop.f32.mrb[2].mxu1 }
 0x21e   :  { %v310_v49 = vadd.f32 %v575_v44, %v309_v48  ;;  %v678_v50 = vpop.f32.mrb[3].mxu1  ;;  %v313_v51 = vmax.f32 %v307_v46, 0.0 }
 0x220   :  { %v314_v52 = vmax.f32 %v310_v49, 0.0 }
 0x222   :  { %v315_v53 = vpack.c.bf16 %v314_v52, %v313_v51 }
 0x224   :  { %696 = vmatmul.mubr.bf16.vlgmr.msra.gmra.mrb[4].mxu0 %v315_v53 }
 0x2f7   :  { %v423_v57 = vpop.f32.mrb[4].mxu0 }
 0x2f8   :  { %v424_v58 = vadd.f32 %v585_v56, %v423_v57  ;;  %v697_v59 = vpop.f32.mrb[5].mxu0 }
 0x2f9   :  { %v426_v60 = vpop.f32.mrb[6].mxu0 }
 0x2fa   :  { %v427_v61 = vadd.f32 %v585_v56, %v426_v60  ;;  %v698_v62 = vpop.f32.mrb[7].mxu0  ;;  %v430_v63 = vmax.f32 %v424_v58, 0.0 }
 0x2fc   :  { %v431_v1 = vmax.f32 %v427_v61, 0.0 }
 0x2fe   :  { %v432_v2 = vpack.c.bf16 %v431_v1, %v430_v63 }
 0x300   :  { %716 = vmatmul.mubr.bf16.vlgmr.msra.gmra.mrb[4].mxu1 %v432_v2 }
 0x3d3   :  { %v538_v3 = vpop.f32.mrb[4].mxu1 }
 0x3d4   :  { %v539_v4 = vadd.f32 %v594_v0, %v538_v3  ;;  %v717_v5 = vpop.f32.mrb[5].mxu1 }
 0x3d5   :  { %v541_v6 = vpop.f32.mrb[6].mxu1 }
 0x3d6   :  { %545 = vst [vmem:[#allocation10] sm:$0xff] %v539_v4  ;;  %v542_v7 = vadd.f32 %v594_v0, %v541_v6  ;;  %v718_v8 = vpop.f32.mrb[7].mxu1 }
 0x3d8   :  { %546 = vst [vmem:[#allocation10 + $0x8] sm:$0xff] %v542_v7 }
 0x3d9   :  { %861 = shalt.err (!%p858_p8)
}
 0x3da   :  { %s862_s17 = scalar_lea.hbm %s1072_s7, 256 }
 0x3db   :  { %p863_p9 = scmp.ne.s32.totalorder %s1072_s7, %s862_s17  ;;  %p866_p10 = scmp.lt.u32.totalorder %s862_s17, %s1072_s7 }
 0x3dd   :  { %p868_p11 = pnand %p866_p10, %p863_p9 }
 0x3df   :  { %871 = shalt.err (!%p868_p11)
}
 0x3e0   :  { %558 = dma.vmem_to_hbm [thread:$0]  %s553_s14, 256, %s1072_s7, [#allocation4], %s884_s1, %s884_s1, %s885_s25  }
 0x3e1   :  { %878 = dma.done.wait [#allocation4], 256  }
 0x3e2   :  { %879 = vsyncadd [#allocation4], 4294967040 }
 0x3e3   :  { %562 = vsyncpa [#allocation3], 1 }
 0x3e4   :  { %563 = vsyncpa [#allocation6], 1 }
 0x3e5   :  { %564 = vsyncpa [#allocation9], 1 }
 0x3e6   :  { %565 = vsyncpa [#allocation4], 1 }

</bundles_post_ra>
